<compile_context>
chip_gen: v7x
topology: tpu7x:2x2x1
jax: 0.10.0
libtpu: 0.0.40
codegen_flags: <defaults>
</compile_context>

<pallas_src>
import functools

import jax
import jax.numpy as jnp
from jax.experimental import pallas as pl
from jax.experimental.pallas import tpu as pltpu


def _dice_partial_kernel(logits_ref, label_ref, numer_ref, denom_ref,
                         *, p, ignore_lb):
    # logits_ref: (1, C, S, 128) input dtype
    # label_ref : (1, S, 128)    int32
    # numer_ref / denom_ref: (1, 1, 8, 128) f32 per-block partial sums
    logits = logits_ref[0].astype(jnp.float32)        # (C, S, 128)
    label = label_ref[0]                               # (S, 128)
    C, S, L = logits.shape

    probs = jax.nn.sigmoid(logits)                     # EUP, f32

    valid = label != ignore_lb                         # (S, 128)
    lbl = jnp.where(valid, label, -1)                  # ignored -> matches no channel

    # numer: sum_c probs[c] where label == c (no float one-hot materialized).
    numer_sl = jnp.zeros((S, L), jnp.float32)
    for c in range(C):                                 # static unroll, C is small
        numer_sl = numer_sl + jnp.where(lbl == c, probs[c], 0.0)

    # denom: sum_c probs[c]**p + (# valid pixels); one_hot**p == one_hot (p>0).
    probs_p = probs if p == 1 else probs ** p
    denom_sl = jnp.sum(probs_p, axis=0) + valid.astype(jnp.float32)   # (S, 128)

    # Fold sublane groups to an (8, 128) vreg-shaped partial; the cross-lane
    # collapse is deferred to the host-side jnp.sum (keeps the kernel VPU-only).
    def fold8(x):
        return x.reshape(S // 8, 8, L).sum(axis=0)

    numer_ref[...] = fold8(numer_sl)[None, None]
    denom_ref[...] = fold8(denom_sl)[None, None]


def batch_soft_dice_loss(logits, label, *, p=1, smooth=1.0, ignore_lb=255):
    """logits: (N, C, H, W) float; label: (N, H, W) int.  Returns scalar loss."""
    # TODO(synk): optional per-class `weight` vector not supported (module default None).
    N, C, H, W = logits.shape
    HW = H * W
    LANE, SUB = 128, 8

    if not jnp.issubdtype(logits.dtype, jnp.floating):
        logits = logits.astype(jnp.float32)            # module does logits.float()
    itemsize = jnp.dtype(logits.dtype).itemsize

    # Pick ~2 MiB logits tiles (rows of 128 lanes, row count a multiple of 8):
    # double-buffered this stays well inside v7x's tighter VMEM budget.
    target_bytes = 2 * 1024 * 1024
    s_rows = max(SUB, (target_bytes // (C * LANE * itemsize)) // SUB * SUB)
    s_rows = min(s_rows, 2048)
    r_raw = -(-HW // LANE)                             # ceil(HW / 128)
    if r_raw <= s_rows:
        s_rows = -(-r_raw // SUB) * SUB                # single tile, rounded to 8
    r_pad = -(-r_raw // s_rows) * s_rows
    n_tiles = r_pad // s_rows
    hw_pad = r_pad * LANE
    pad = hw_pad - HW

    lg = logits.reshape(N, C, HW)
    # TODO(synk): label could be carried as uint8 to cut its HBM traffic; kept
    # int32 for layout simplicity (beware int8 inputs wrapping 255 -> -1).
    lb = label.reshape(N, HW).astype(jnp.int32)
    if pad:
        pad_val = float(jnp.finfo(logits.dtype).min)   # sigmoid(pad_val) == 0 exactly
        lg = jnp.pad(lg, ((0, 0), (0, 0), (0, pad)), constant_values=pad_val)
        lb = jnp.pad(lb, ((0, 0), (0, pad)), constant_values=int(ignore_lb))
    lg = lg.reshape(N, C, r_pad, LANE)
    lb = lb.reshape(N, r_pad, LANE)

    numer_p, denom_p = pl.pallas_call(
        functools.partial(_dice_partial_kernel, p=p, ignore_lb=int(ignore_lb)),
        out_shape=(
            jax.ShapeDtypeStruct((N, n_tiles, 8, LANE), jnp.float32),
            jax.ShapeDtypeStruct((N, n_tiles, 8, LANE), jnp.float32),
        ),
        grid_spec=pltpu.PrefetchScalarGridSpec(
            num_scalar_prefetch=0,
            grid=(N, n_tiles),
            in_specs=[
                pl.BlockSpec((1, C, s_rows, LANE), lambda n, t: (n, 0, t, 0)),
                pl.BlockSpec((1, s_rows, LANE), lambda n, t: (n, t, 0)),
            ],
            out_specs=[
                pl.BlockSpec((1, 1, 8, LANE), lambda n, t: (n, t, 0, 0)),
                pl.BlockSpec((1, 1, 8, LANE), lambda n, t: (n, t, 0, 0)),
            ],
        ),
        compiler_params=pltpu.CompilerParams(
            dimension_semantics=("parallel", "parallel")),
    )(lg, lb)

    numer = jnp.sum(numer_p)
    denom = jnp.sum(denom_p)
    return 1.0 - (2.0 * numer + smooth) / (denom + smooth)


def _reference(logits, label, *, p=1, smooth=1.0, ignore_lb=255):
    logits = logits.astype(jnp.float32)
    N, C, H, W = logits.shape
    ignore = label == ignore_lb
    lbl = jnp.where(ignore, 0, label)
    one_hot = jax.nn.one_hot(lbl, C, axis=1, dtype=jnp.float32)
    one_hot = jnp.where(ignore[:, None, :, :], 0.0, one_hot)
    probs = jax.nn.sigmoid(logits)
    numer = jnp.sum(probs * one_hot)
    denom = jnp.sum(probs ** p + one_hot ** p)
    return 1.0 - (2.0 * numer + smooth) / (denom + smooth)


if __name__ == "__main__":
    key = jax.random.PRNGKey(0)
    k1, k2 = jax.random.split(key)

    N, C, H, W = 2, 4, 16, 16
    logits = jax.random.normal(k1, (N, C, H, W), dtype=jnp.float32)
    label = jax.random.randint(k2, (N, H, W), 0, C, dtype=jnp.int32)
    # deterministically mark a few positions as ignored (255)
    label = label.at[0, 0, :4].set(255)
    label = label.at[1, 5, 7].set(255)

    loss = jax.block_until_ready(batch_soft_dice_loss(logits, label))
    ref = _reference(logits, label)
    assert jnp.allclose(loss, ref, atol=1e-5, rtol=1e-5), (loss, ref)

    # bf16 streaming path (no wrapper upcast): reference casts to f32 internally,
    # so results must agree tightly.
    logits_bf16 = logits.astype(jnp.bfloat16)
    loss_bf16 = jax.block_until_ready(batch_soft_dice_loss(logits_bf16, label))
    ref_bf16 = _reference(logits_bf16, label)
    assert jnp.allclose(loss_bf16, ref_bf16, atol=1e-5, rtol=1e-5), (loss_bf16, ref_bf16)

    print("KERNEL_OK")
</pallas_src>

<mosaic_0001>
module attributes {stable_mosaic.version = 11 : i64} {
  func.func @_dice_partial_kernel(%arg0: i32, %arg1: i32, %arg2: memref<1x4x8x128xf32, #tpu.memory_space<vmem>>, %arg3: memref<1x8x128xi32, #tpu.memory_space<vmem>>, %arg4: memref<1x1x8x128xf32, #tpu.memory_space<vmem>>, %arg5: memref<1x1x8x128xf32, #tpu.memory_space<vmem>>) attributes {dimension_semantics = [#tpu.dimension_semantics<parallel>, #tpu.dimension_semantics<parallel>], iteration_bounds = array<i64: 2, 1>, scalar_prefetch = 0 : i64, scratch_operands = 0 : i64, tpu.core_type = #tpu.core_type<tc>, window_params = [{transform_indices = @transform_0, window_bounds = array<i64: 1, 4, 8, 128>}, {transform_indices = @transform_1, window_bounds = array<i64: 1, 8, 128>}, {transform_indices = @transform_2, window_bounds = array<i64: 1, 1, 8, 128>}, {transform_indices = @transform_3, window_bounds = array<i64: 1, 1, 8, 128>}]} {
    %c0 = arith.constant 0 : index
    %c0_0 = arith.constant 0 : index
    %c0_1 = arith.constant 0 : index
    %c0_2 = arith.constant 0 : index
    %0 = vector.load %arg2[%c0, %c0_0, %c0_1, %c0_2] : memref<1x4x8x128xf32, #tpu.memory_space<vmem>>, vector<1x4x8x128xf32>
    %1 = vector.shape_cast %0 : vector<1x4x8x128xf32> to vector<4x8x128xf32>
    %c0_3 = arith.constant 0 : index
    %c0_4 = arith.constant 0 : index
    %c0_5 = arith.constant 0 : index
    %2 = vector.load %arg3[%c0_3, %c0_4, %c0_5] : memref<1x8x128xi32, #tpu.memory_space<vmem>>, vector<1x8x128xi32>
    %3 = vector.shape_cast %2 : vector<1x8x128xi32> to vector<8x128xi32>
    %4 = arith.negf %1 : vector<4x8x128xf32>
    %5 = math.exp %4 : vector<4x8x128xf32>
    %cst = arith.constant 1.000000e+00 : f32
    %6 = vector.broadcast %cst : f32 to vector<4x8x128xf32>
    %7 = arith.addf %6, %5 : vector<4x8x128xf32>
    %8 = arith.divf %6, %7 : vector<4x8x128xf32>
    %c255_i32 = arith.constant 255 : i32
    %9 = vector.broadcast %c255_i32 : i32 to vector<8x128xi32>
    %10 = arith.cmpi ne, %3, %9 : vector<8x128xi32>
    %c-1_i32 = arith.constant -1 : i32
    %11 = vector.broadcast %c-1_i32 : i32 to vector<8x128xi32>
    %12 = arith.select %10, %3, %11 : vector<8x128xi1>, vector<8x128xi32>
    %cst_6 = arith.constant 0.000000e+00 : f32
    %13 = vector.broadcast %cst_6 : f32 to vector<8x128xf32>
    %c0_i32 = arith.constant 0 : i32
    %14 = vector.broadcast %c0_i32 : i32 to vector<8x128xi32>
    %15 = arith.cmpi eq, %12, %14 : vector<8x128xi32>
    %16 = vector.extract_strided_slice %8 {offsets = [0, 0, 0], sizes = [1, 8, 128], strides = [1, 1, 1]} : vector<4x8x128xf32> to vector<1x8x128xf32>
    %17 = vector.shape_cast %16 : vector<1x8x128xf32> to vector<8x128xf32>
    %cst_7 = arith.constant 0.000000e+00 : f32
    %18 = vector.broadcast %cst_7 : f32 to vector<8x128xf32>
    %19 = arith.select %15, %17, %18 : vector<8x128xi1>, vector<8x128xf32>
    %20 = arith.addf %13, %19 : vector<8x128xf32>
    %c1_i32 = arith.constant 1 : i32
    %21 = vector.broadcast %c1_i32 : i32 to vector<8x128xi32>
    %22 = arith.cmpi eq, %12, %21 : vector<8x128xi32>
    %23 = vector.extract_strided_slice %8 {offsets = [1, 0, 0], sizes = [1, 8, 128], strides = [1, 1, 1]} : vector<4x8x128xf32> to vector<1x8x128xf32>
    %24 = vector.shape_cast %23 : vector<1x8x128xf32> to vector<8x128xf32>
    %cst_8 = arith.constant 0.000000e+00 : f32
    %25 = vector.broadcast %cst_8 : f32 to vector<8x128xf32>
    %26 = arith.select %22, %24, %25 : vector<8x128xi1>, vector<8x128xf32>
    %27 = arith.addf %20, %26 : vector<8x128xf32>
    %c2_i32 = arith.constant 2 : i32
    %28 = vector.broadcast %c2_i32 : i32 to vector<8x128xi32>
    %29 = arith.cmpi eq, %12, %28 : vector<8x128xi32>
    %30 = vector.extract_strided_slice %8 {offsets = [2, 0, 0], sizes = [1, 8, 128], strides = [1, 1, 1]} : vector<4x8x128xf32> to vector<1x8x128xf32>
    %31 = vector.shape_cast %30 : vector<1x8x128xf32> to vector<8x128xf32>
    %cst_9 = arith.constant 0.000000e+00 : f32
    %32 = vector.broadcast %cst_9 : f32 to vector<8x128xf32>
    %33 = arith.select %29, %31, %32 : vector<8x128xi1>, vector<8x128xf32>
    %34 = arith.addf %27, %33 : vector<8x128xf32>
    %c3_i32 = arith.constant 3 : i32
    %35 = vector.broadcast %c3_i32 : i32 to vector<8x128xi32>
    %36 = arith.cmpi eq, %12, %35 : vector<8x128xi32>
    %37 = vector.extract_strided_slice %8 {offsets = [3, 0, 0], sizes = [1, 8, 128], strides = [1, 1, 1]} : vector<4x8x128xf32> to vector<1x8x128xf32>
    %38 = vector.shape_cast %37 : vector<1x8x128xf32> to vector<8x128xf32>
    %cst_10 = arith.constant 0.000000e+00 : f32
    %39 = vector.broadcast %cst_10 : f32 to vector<8x128xf32>
    %40 = arith.select %36, %38, %39 : vector<8x128xi1>, vector<8x128xf32>
    %41 = arith.addf %34, %40 : vector<8x128xf32>
    %cst_11 = arith.constant dense<0.000000e+00> : vector<8x128xf32>
    %42 = vector.multi_reduction <add>, %8, %cst_11 [0] : vector<4x8x128xf32> to vector<8x128xf32>
    %43 = arith.extui %10 : vector<8x128xi1> to vector<8x128xi32>
    %44 = arith.sitofp %43 : vector<8x128xi32> to vector<8x128xf32>
    %45 = arith.addf %42, %44 : vector<8x128xf32>
    %46 = vector.shape_cast %41 : vector<8x128xf32> to vector<1x8x128xf32>
    %cst_12 = arith.constant dense<0.000000e+00> : vector<8x128xf32>
    %47 = vector.multi_reduction <add>, %46, %cst_12 [0] : vector<1x8x128xf32> to vector<8x128xf32>
    %48 = vector.shape_cast %47 : vector<8x128xf32> to vector<1x1x8x128xf32>
    %c0_13 = arith.constant 0 : index
    %c0_14 = arith.constant 0 : index
    %c0_15 = arith.constant 0 : index
    %c0_16 = arith.constant 0 : index
    %49 = vector.load %arg4[%c0_13, %c0_14, %c0_15, %c0_16] : memref<1x1x8x128xf32, #tpu.memory_space<vmem>>, vector<1x1x8x128xf32>
    tpu.vector_store %arg4[%c0_13, %c0_14, %c0_15, %c0_16], %48 {strides = array<i32>} : memref<1x1x8x128xf32, #tpu.memory_space<vmem>>, vector<1x1x8x128xf32>,
    %50 = vector.shape_cast %45 : vector<8x128xf32> to vector<1x8x128xf32>
    %cst_17 = arith.constant dense<0.000000e+00> : vector<8x128xf32>
    %51 = vector.multi_reduction <add>, %50, %cst_17 [0] : vector<1x8x128xf32> to vector<8x128xf32>
    %52 = vector.shape_cast %51 : vector<8x128xf32> to vector<1x1x8x128xf32>
    %c0_18 = arith.constant 0 : index
    %c0_19 = arith.constant 0 : index
    %c0_20 = arith.constant 0 : index
    %c0_21 = arith.constant 0 : index
    %53 = vector.load %arg5[%c0_18, %c0_19, %c0_20, %c0_21] : memref<1x1x8x128xf32, #tpu.memory_space<vmem>>, vector<1x1x8x128xf32>
    tpu.vector_store %arg5[%c0_18, %c0_19, %c0_20, %c0_21], %52 {strides = array<i32>} : memref<1x1x8x128xf32, #tpu.memory_space<vmem>>, vector<1x1x8x128xf32>,
    return
  }
  func.func @transform_0(%arg0: i32, %arg1: i32) -> (i32, i32, i32, i32) {
    %c0_i32 = arith.constant 0 : i32
    %c0_i32_0 = arith.constant 0 : i32
    %c0_i32_1 = arith.constant 0 : i32
    return %arg0, %c0_i32, %arg1, %c0_i32_0 : i32, i32, i32, i32
  }
  func.func @transform_1(%arg0: i32, %arg1: i32) -> (i32, i32, i32) {
    %c0_i32 = arith.constant 0 : i32
    %c0_i32_0 = arith.constant 0 : i32
    return %arg0, %arg1, %c0_i32 : i32, i32, i32
  }
  func.func @transform_2(%arg0: i32, %arg1: i32) -> (i32, i32, i32, i32) {
    %c0_i32 = arith.constant 0 : i32
    %c0_i32_0 = arith.constant 0 : i32
    %c0_i32_1 = arith.constant 0 : i32
    return %arg0, %arg1, %c0_i32, %c0_i32_0 : i32, i32, i32, i32
  }
  func.func @transform_3(%arg0: i32, %arg1: i32) -> (i32, i32, i32, i32) {
    %c0_i32 = arith.constant 0 : i32
    %c0_i32_0 = arith.constant 0 : i32
    %c0_i32_1 = arith.constant 0 : i32
    return %arg0, %arg1, %c0_i32, %c0_i32_0 : i32, i32, i32, i32
  }
}

</mosaic_0001>

<bundles_post_ra>
// kernel: tpu_custom_call.1
= control target key start
LH: loop header
LB: loop body
LE: loop exit
PB: predicated region body
PF: predicated region fallthrough
CT: control target
= control target key end

     0   :  { %9 = vsyncpa [#allocation3], 0  ;;  %s1059_s0 = inlined_call_operand.hbm [shape: f32[2,4,8,128], index: 0, kind: input, shape index: {}]   ;;  %s1060_s1 = inlined_call_operand.hbm [shape: s32[2,8,128], index: 1, kind: input, shape index: {}]   ;;  %s1061_s2 = inlined_call_operand.hbm [shape: f32[2,1,8,128], index: 2, kind: output, shape index: {0}]   ;;  %s1062_s3 = inlined_call_operand.hbm [shape: f32[2,1,8,128], index: 3, kind: output, shape index: {1}]  }
   0x1   :  { %11 = vsyncpa [#allocation3 + $0x1], 0 }
   0x2   :  { %12 = vsyncpa [#allocation6], 0 }
   0x3   :  { %14 = vsyncpa [#allocation6 + $0x1], 0 }
   0x4   :  { %15 = vsyncpa [#allocation4], 0 }
   0x5   :  { %17 = vsyncpa [#allocation4 + $0x1], 0 }
   0x6   :  { %18 = vsyncpa [#allocation9], 0 }
   0x7   :  { %20 = vsyncpa [#allocation9 + $0x1], 0  ;;  %s808_s12 = smov 0   ;;  %s810_s13 = smov 0  }
   0x8   :  { %s812_s14 = smov 0   ;;  %s814_s15 = smov 0  }
   0x9   :  { %s816_s16 = smov 0   ;;  %s818_s17 = smov 0  }
   0xa LB: > { %s484_s18 = sadd.s32 4294967295, %s779_s17   ;;  %s485_s19 = sadd.s32 4294967294, %s779_s17   ;;  %s779_s17 = sphi %s818_s17, %s26_s17   ;;  %s775_s16 = sphi %s816_s16, %s1081_s16   ;;  %s771_s15 = sphi %s814_s15, %s1080_s15   ;;  %s767_s14 = sphi %s812_s14, %s1079_s14   ;;  %s763_s13 = sphi %s810_s13, %s1078_s13   ;;  %s759_s12 = sphi %s808_s12, %s1077_s12  }
   0xb   : > { %s38_s20 = sadd.s32 1, %s775_s16  ;;  %s47_s21 = sadd.s32 1, %s767_s14 }
   0xc   : > { %p40_p0 = scmp.ge.s32.totalorder %s38_s20, 2  ;;  %p54_p1 = scmp.ne.s32.totalorder %s767_s14, %s763_s13 }
   0xd   : > { %p55_p2 = scmp.eq.s32.totalorder %s779_s17, 0  ;;  %p60_p3 = scmp.ne.s32.totalorder %s763_s13, %s759_s12 }
   0xe   : > { %s1083_s20 = smov (%p40_p0, %s38_s20), 0  ;;  %p61_p5 = scmp.eq.s32.totalorder %s484_s18, 0 }
   0xf   : > { %p849_p4 = por %p55_p2, %p54_p1  ;;  %s42_s23 = ssub.s32 %s775_s16, %s1083_s20 }
  0x10   : > { %p114_p6 = scmp.eq.s32.totalorder %s484_s18, 1  ;;  %p45_p7 = scmp.eq.s32.totalorder %s42_s23, 0 }
  0x11   : > { %p855_p8 = por %p61_p5, %p60_p3  ;;  %p120_p10 = scmp.eq.s32.totalorder %s485_s19, 1 }
  0x12   : > { %p859_p9 = por %p114_p6, %p54_p1  ;;  %p532_p13 = scmp.lt.s32.totalorder %s779_s17, 2 }
  0x13   : > { %s1066_s24 = scalar_select %p855_p8, 1, 0 }
  0x14   : > { %s1067_s25 = scalar_select %p859_p9, 1, 0 }
  0x15   : > { %s864_s26 = scalar_select %p45_p7, %s767_s14, %s47_s21  }
  0x16   : > { %p866_p11 = por %p120_p10, %p60_p3  ;;  %s873_s28 = sand.u32 1, %s767_s14  }
  0x17   : > { %s488_s29 = sshll.u32 %s873_s28, 5  ;;  %s509_s30 = sshll.u32 %s775_s16, 9 }
  0x18   : > { %s1068_s27 = scalar_select %p866_p11, 1, 0 }
  0x19   : > { %s880_s6 = scalar_lea.hbm %s1059_s0, %s509_s30  ;;  %s172_s7 = scalar_lea.vmem [#allocation2], %s488_s29 }
  0x1a   : > { %s180_s8 = sshll.u32 %s172_s7, 4  ;;  %p886_p0 = pnand %p532_p13, %p849_p4  ;;  %s882_s8 = int_to_ptr.vmem [resolvable:$true] %s180_s8 }
  0x1b   : > { %s169_s10 = scalar_lea.sflag [#allocation3], %s873_s28  ;;  %s601_s11 = scalar_lea.hbm %s880_s6, 512 }
  0x1c   : > { %p602_p2 = scmp.ne.s32.totalorder %s880_s6, %s601_s11  ;;  %p603_p3 = pneg %p886_p0 }
  0x1d   : > { %s606_s21 = scalar_lea.hbm %s1059_s0, 1024  ;;  %p607_p4 = scmp.lt.u32.totalorder %s880_s6, %s1059_s0 }
  0x1e   : > { %p604_p5 = pnand %p603_p3, %p602_p2  ;;  %p608_p7 = scmp.lt.u32.totalorder %s606_s21, %s601_s11 }
  0x1f   : > { %p610_p13 = scmp.lt.u32.totalorder %s601_s11, %s880_s6 }
  0x20   : > { %p605_p6 = pneg %p604_p5  ;;  %p609_p10 = por %p608_p7, %p607_p4 }
  0x22   : > { %p611_p12 = por %p610_p13, %p609_p10 }
  0x24   : > { %p612_p1 = pnand %p611_p12, %p605_p6 }
  0x26   : > { %615 = shalt.err (!%p612_p1)
}
  0x27   : > { %s616_s29 = scalar_lea.vmem %s882_s8, 512  ;;  %s781_s30 = smov [#allocation2]  }
  0x28   : > { %p617_p2 = scmp.ne.s32.totalorder %s882_s8, %s616_s29  ;;  %s621_s4 = sshll.u32 %s781_s30, 4  ;;  %s622_s4 = int_to_ptr.vmem [resolvable:$false] %s621_s4 }
  0x29   : > { %s623_s5 = scalar_lea.vmem %s622_s4, 1024  ;;  %p624_p9 = scmp.lt.s32.totalorder %s882_s8, %s622_s4 }
  0x2a   : > { %p619_p5 = pnand %p617_p2, %p603_p3  ;;  %p625_p4 = scmp.lt.s32.totalorder %s623_s5, %s616_s29 }
  0x2c   : > { %p620_p11 = pneg %p619_p5  ;;  %p626_p7 = por %p625_p4, %p624_p9 }
  0x2e   : > { %p627_p10 = pnand %p626_p7, %p620_p11 }
  0x30   : > { %630 = shalt.err (!%p627_p10)
}
  0x31   : > { %s782_s7 = smov 128   ;;  %s783_s11 = smov 8  }
  0x32   : > { %521 = dma.hbm_to_vmem [thread:$0]  (!%p886_p0), %s880_s6, 512, %s882_s8, %s169_s10, %s782_s7, %s782_s7, %s783_s11  }
  0x33   : > { %p207_p12 = scmp.lt.s32.totalorder %s779_s17, 3  ;;  %s491_s18 = sshll.u32 %s873_s28, 3 }
  0x34   : > { %s492_s19 = sshll.u32 %s775_s16, 7  ;;  %p1070_p9 = scmp.ge.s32.totalorder %s779_s17, 1 }
  0x35   : > { %s931_s29 = scalar_lea.hbm %s1060_s1, %s492_s19  ;;  %s194_s30 = scalar_lea.vmem [#allocation5], %s491_s18 }
  0x36   : > { %p924_p11 = pnand %p1070_p9, %p207_p12  ;;  %s202_s4 = sshll.u32 %s194_s30, 4  ;;  %s203_s4 = int_to_ptr.vmem [resolvable:$true] %s202_s4 }
  0x37   : > { %s191_s6 = scalar_lea.sflag [#allocation6], %s873_s28  ;;  %s631_s8 = scalar_lea.hbm %s931_s29, 128 }
  0x38   : > { %s1071_s21 = scalar_select %p924_p11, 1, 0 }
  0x39   : > { %p632_p1 = scmp.ne.s32.totalorder %s931_s29, %s631_s8  ;;  %s636_s7 = scalar_lea.hbm %s1060_s1, 256 }
  0x3a   : > { %p637_p2 = scmp.lt.u32.totalorder %s931_s29, %s1060_s1  ;;  %p638_p5 = scmp.lt.u32.totalorder %s636_s7, %s631_s8 }
  0x3b   : > { %p634_p6 = pnand %p632_p1, %p603_p3  ;;  %p640_p7 = scmp.lt.u32.totalorder %s631_s8, %s931_s29 }
  0x3c   : > { %p639_p4 = por %p638_p5, %p637_p2 }
  0x3d   : > { %p635_p13 = pneg %p634_p6 }
  0x3e   : > { %p641_p10 = por %p640_p7, %p639_p4 }
  0x40   : > { %p642_p12 = pnand %p641_p10, %p635_p13 }
  0x42   : > { %645 = shalt.err (!%p642_p12)
}
  0x43   : > { %s646_s28 = scalar_lea.vmem %s203_s4, 128  ;;  %s784_s18 = smov [#allocation5]  }
  0x44   : > { %p647_p9 = scmp.ne.s32.totalorder %s203_s4, %s646_s28  ;;  %s651_s22 = sshll.u32 %s784_s18, 4  ;;  %s652_s22 = int_to_ptr.vmem [resolvable:$false] %s651_s22 }
  0x45   : > { %s653_s23 = scalar_lea.vmem %s652_s22, 256  ;;  %p654_p8 = scmp.lt.s32.totalorder %s203_s4, %s652_s22 }
  0x46   : > { %p649_p1 = pnand %p647_p9, %p603_p3  ;;  %p655_p11 = scmp.lt.s32.totalorder %s653_s23, %s646_s28 }
  0x48   : > { %p650_p6 = pneg %p649_p1  ;;  %p656_p2 = por %p655_p11, %p654_p8 }
  0x4a   : > { %p657_p5 = pnand %p656_p2, %p650_p6 }
  0x4c   : > { %660 = shalt.err (!%p657_p5)
}
  0x4d   : > { %524 = dma.hbm_to_vmem [thread:$0]  (!%p886_p0), %s931_s29, 128, %s203_s4, %s191_s6  }
  0x4e   : > { %p1072_p13 = scmp.ne.s32.totalorder %s1071_s21, 0 }
  0x4f   : > { %s956_s30 = sand.u32 (!%p1072_p13), 1, %s763_s13   ;;  %p1073_p3 = scmp.ne.s32.totalorder (!%p1072_p13), %s1066_s24, 0 }
  0x50   : > { %211 = sbr.rel (%p1072_p13) target bundleno = 164 (0xa4), region = 28  ;;  %s494_s8 = sshll.u32 (!%p1072_p13), %s956_s30, 5 }
  0x51   : > { %s214_s10 = scalar_lea.sflag (!%p1072_p13), [#allocation3], %s956_s30  ;;  %s217_s5 = scalar_lea.vmem (!%p1072_p13), [#allocation2], %s494_s8 }
  0x57   : > { %742 = dma.done.wait (%p1073_p3), %s214_s10, 512  }
  0x58   : > { %744 = vsyncadd (%p1073_p3), %s214_s10, 4294966784  ;;  %s965_s9 = sshll.u32 %s956_s30, 3  ;;  %s223_s21 = scalar_lea.sflag [#allocation6], %s956_s30 }
  0x59   : > { %s226_s29 = scalar_lea.vmem [#allocation5], %s965_s9 }
  0x5a   : > { %746 = dma.done.wait (%p1073_p3), %s223_s21, 128  }
  0x5b   : > { %748 = vsyncadd (%p1073_p3), %s223_s21, 4294967168  ;;  %v259_v0 = vld [vmem:[%s217_s5] sm:$0xff]  ;;  %v260_v1 = vld [vmem:[%s217_s5 + $0x8] sm:$0xff]  ;;  %s251_s24 = scalar_lea.vmem [#allocation7], %s965_s9  ;;  %s258_s6 = scalar_lea.vmem [#allocation8], %s965_s9  ;;  %v785_v30 = vmov 0.0  }
  0x5c   : > { %v261_v2 = vld [vmem:[%s217_s5 + $0x10] sm:$0xff]  ;;  %v262_v3 = vld [vmem:[%s217_s5 + $0x18] sm:$0xff]  ;;  %v498_v4 = vmul.f32 -1.442695, %v259_v0  ;;  %v499_v5 = vmul.f32 -1.442695, %v260_v1 }
  0x5d   : > { %v500_v6 = vmul.f32 -1.442695, %v261_v2  ;;  %v501_v7 = vmul.f32 -1.442695, %v262_v3  ;;  %v263_v12 = vld [vmem:[%s226_s29] sm:$0xff]  ;;  %s332_s4 = sshll.u32 %s251_s24, 4  ;;  %s978_s4 = int_to_ptr.vmem [resolvable:$true] %s332_s4 }
  0x5e   : > { %585 = vpow2.f32 %v498_v4  ;;  %vm288_vm0 = vcmp.ne.s32.totalorder %v263_v12, 255  ;;  %s346_s7 = sshll.u32 %s258_s6, 4  ;;  %s505_s11 = sshll.u32 %s771_s15, 7  ;;  %s980_s7 = int_to_ptr.vmem [resolvable:$true] %s346_s7 }
  0x5f   : > { %587 = vpow2.f32 %v499_v5  ;;  %v289_v17 = vsel %vm288_vm0, %v263_v12, 4294967295  ;;  %v502_v31 = vsel %vm288_vm0, 1.0, %v785_v30  ;;  %s985_s18 = scalar_lea.hbm %s1061_s2, %s505_s11  ;;  %s990_s23 = scalar_lea.hbm %s1062_s3, %s505_s11 }
  0x60   : > { %589 = vpow2.f32 %v500_v6  ;;  %vm290_vm1 = vcmp.eq.s32.totalorder %v289_v17, 0  ;;  %vm293_vm2 = vcmp.eq.s32.totalorder %v289_v17, 1  ;;  %vm296_vm3 = vcmp.eq.s32.totalorder %v289_v17, 2  ;;  %s313_s8 = scalar_lea.sflag [#allocation4], %s956_s30  ;;  %s661_s10 = scalar_lea.vmem %s978_s4, 128 }
  0x61   : > { %591 = vpow2.f32 %v501_v7  ;;  %vm299_vm4 = vcmp.eq.s32.totalorder %v289_v17, 3  ;;  %p662_p8 = scmp.ne.s32.totalorder %s978_s4, %s661_s10  ;;  %p1074_p0 = scmp.ne.s32.totalorder %s1067_s25, 0 }
  0x62   : > { %s786_s5 = smov [#allocation7]  }
  0x63   : > { %p663_p11 = pnand %p662_p8, %p1074_p0  ;;  %s665_s9 = sshll.u32 %s786_s5, 4  ;;  %s666_s9 = int_to_ptr.vmem [resolvable:$false] %s665_s9 }
  0x64   : > { %s667_s21 = scalar_lea.vmem %s666_s9, 256  ;;  %p668_p7 = scmp.lt.s32.totalorder %s978_s4, %s666_s9 }
  0x65   : > { %p664_p4 = pneg %p663_p11  ;;  %p669_p10 = scmp.lt.s32.totalorder %s667_s21, %s661_s10 }
  0x67   : > { %p670_p12 = por %p669_p10, %p668_p7 }
  0x68   : > { %v586_v8 = vpop.eup %585 }
  0x69   : > { %v588_v9 = vpop.eup %587  ;;  %v276_v10 = vadd.f32 1.0, %v586_v8  ;;  %p671_p9 = pnand %p670_p12, %p664_p4 }
  0x6a   : > { %v590_v11 = vpop.eup %589  ;;  %v277_v13 = vadd.f32 1.0, %v588_v9 }
  0x6b   : > { %v592_v14 = vpop.eup %591  ;;  %v278_v15 = vadd.f32 1.0, %v590_v11  ;;  %593 = vrcp.f32 %v276_v10 }
  0x6c   : > { %v279_v16 = vadd.f32 1.0, %v592_v14  ;;  %595 = vrcp.f32 %v277_v13 }
  0x6d   : > { %597 = vrcp.f32 %v278_v15 }
  0x6e   : > { %599 = vrcp.f32 %v279_v16 }
  0x75   : > { %v594_v18 = vpop.eup %593 }
  0x76   : > { %v596_v19 = vpop.eup %595  ;;  %v291_v20 = vsel %vm290_vm1, %v594_v18, 0.0 }
  0x77   : > { %v598_v21 = vpop.eup %597  ;;  %v294_v22 = vsel %vm293_vm2, %v596_v19, 0.0  ;;  %v302_v23 = vadd.f32 %v596_v19, %v594_v18 }
  0x78   : > { %v600_v24 = vpop.eup %599  ;;  %v295_v25 = vadd.f32 %v294_v22, %v291_v20  ;;  %v297_v26 = vsel %vm296_vm3, %v598_v21, 0.0 }
  0x79   : > { %v300_v27 = vsel %vm299_vm4, %v600_v24, 0.0  ;;  %v303_v28 = vadd.f32 %v598_v21, %v302_v23 }
  0x7a   : > { %v298_v29 = vadd.f32 %v297_v26, %v295_v25 }
  0x7b   : > { %v304_v32 = vadd.f32 %v600_v24, %v303_v28 }
  0x7c   : > { %v301_v33 = vadd.f32 %v300_v27, %v298_v29 }
  0x7d   : > { %v307_v34 = vadd.f32 %v502_v31, %v304_v32 }
  0x7e   : > { %309 = vst [vmem:[%s251_s24] sm:$0xff] %v301_v33 }
  0x7f   : > { %311 = vst [vmem:[%s258_s6] sm:$0xff] %v307_v34 }
  0x80   : > { %674 = shalt.err (!%p671_p9)
}
  0x81   : > { %s675_s29 = scalar_lea.hbm %s985_s18, 128  ;;  %s679_s11 = scalar_lea.hbm %s1061_s2, 256 }
  0x82   : > { %p676_p1 = scmp.ne.s32.totalorder %s985_s18, %s675_s29  ;;  %p680_p5 = scmp.lt.u32.totalorder %s985_s18, %s1061_s2 }
  0x83   : > { %p681_p13 = scmp.lt.u32.totalorder %s679_s11, %s675_s29  ;;  %p683_p8 = scmp.lt.u32.totalorder %s675_s29, %s985_s18 }
  0x84   : > { %p677_p6 = pnand %p676_p1, %p1074_p0 }
  0x85   : > { %p682_p3 = por %p681_p13, %p680_p5 }
  0x86   : > { %p678_p2 = pneg %p677_p6 }
  0x87   : > { %p684_p11 = por %p683_p8, %p682_p3 }
  0x89   : > { %p685_p4 = pnand %p684_p11, %p678_p2 }
  0x8b   : > { %688 = shalt.err (!%p685_p4)
}
  0x8c   : > { %514 = dma.vmem_to_hbm [thread:$0]  (%p1074_p0), %s978_s4, 128, %s985_s18, %s313_s8  }
  0x8d   : > { %s318_s15 = scalar_lea.sflag [#allocation9], %s956_s30  ;;  %s689_s22 = scalar_lea.vmem %s980_s7, 128 }
  0x8e   : > { %p690_p7 = scmp.ne.s32.totalorder %s980_s7, %s689_s22  ;;  %s787_s10 = smov [#allocation8]  }
  0x8f   : > { %s693_s5 = sshll.u32 %s787_s10, 4  ;;  %s694_s5 = int_to_ptr.vmem [resolvable:$false] %s693_s5 }
  0x90   : > { %p691_p10 = pnand %p690_p7, %p1074_p0  ;;  %s695_s9 = scalar_lea.vmem %s694_s5, 256 }
  0x91   : > { %p696_p9 = scmp.lt.s32.totalorder %s980_s7, %s694_s5  ;;  %p697_p1 = scmp.lt.s32.totalorder %s695_s9, %s689_s22 }
  0x92   : > { %p692_p12 = pneg %p691_p10 }
  0x93   : > { %p698_p6 = por %p697_p1, %p696_p9 }
  0x95   : > { %p699_p2 = pnand %p698_p6, %p692_p12 }
  0x97   : > { %702 = shalt.err (!%p699_p2)
}
  0x98   : > { %s703_s30 = scalar_lea.hbm %s990_s23, 128  ;;  %s707_s8 = scalar_lea.hbm %s1062_s3, 256 }
  0x99   : > { %p704_p5 = scmp.ne.s32.totalorder %s990_s23, %s703_s30  ;;  %p708_p8 = scmp.lt.u32.totalorder %s990_s23, %s1062_s3 }
  0x9a   : > { %p709_p11 = scmp.lt.u32.totalorder %s707_s8, %s703_s30  ;;  %p711_p7 = scmp.lt.u32.totalorder %s703_s30, %s990_s23 }
  0x9b   : > { %p705_p13 = pnand %p704_p5, %p1074_p0 }
  0x9c   : > { %p710_p4 = por %p709_p11, %p708_p8 }
  0x9d   : > { %p706_p3 = pneg %p705_p13 }
  0x9e   : > { %p712_p10 = por %p711_p7, %p710_p4 }
  0xa0   : > { %p713_p12 = pnand %p712_p10, %p706_p3 }
  0xa2   : > { %716 = shalt.err (!%p713_p12)
}
  0xa3   : > { %515 = dma.vmem_to_hbm [thread:$0]  (%p1074_p0), %s980_s7, 128, %s990_s23, %s318_s15  }
  0xa4 PF: > { %s358_s24 = sand.u32 1, %s759_s12   ;;  %p1075_p9 = scmp.ne.s32.totalorder %s1068_s27, 0 }
  0xa5   : > { %p1076_p1 = scmp.ge.s32.totalorder %s779_s17, 2  ;;  %s359_s6 = scalar_lea.sflag [#allocation4], %s358_s24 }
  0xa7   : > { %p526_p6 = pnand %p1076_p1, %p1075_p9 }
  0xa9   : > { %750 = dma.done.wait (!%p526_p6), %s359_s6, 128  }
  0xaa   : > { %752 = vsyncadd (!%p526_p6), %s359_s6, 4294967168  ;;  %s368_s11 = scalar_lea.sflag [#allocation9], %s358_s24 }
  0xab   : > { %754 = dma.done.wait (!%p526_p6), %s368_s11, 128  }
  0xac   : > { %756 = vsyncadd (!%p526_p6), %s368_s11, 4294967168  ;;  %s26_s17 = sadd.s32 1, %s779_s17   ;;  %s1077_s12 = smov %s763_s13 }
  0xad   : > { %p23_p2 = scmp.ge.s32.totalorder %s26_s17, 4   ;;  %s1078_s13 = smov %s767_s14 }
  0xae   : > { %s1079_s14 = smov %s864_s26  ;;  %s1080_s15 = smov %s775_s16 }
  0xaf   : > { %s1081_s16 = smov %s1083_s20  ;;  %25 = sbr.rel (!%p23_p2) target bundleno = 10 (0xa), region = 103 }
  0xb6   :  { %373 = vsyncpa [#allocation3], 1 }
  0xb7   :  { %375 = vsyncpa [#allocation3 + $0x1], 1 }
  0xb8   :  { %376 = vsyncpa [#allocation6], 1 }
  0xb9   :  { %378 = vsyncpa [#allocation6 + $0x1], 1 }
  0xba   :  { %379 = vsyncpa [#allocation4], 1 }
  0xbb   :  { %381 = vsyncpa [#allocation4 + $0x1], 1 }
  0xbc   :  { %382 = vsyncpa [#allocation9], 1 }
  0xbd   :  { %384 = vsyncpa [#allocation9 + $0x1], 1 }

</bundles_post_ra>
